<compile_context>
chip_gen: v7x
topology: tpu7x:2x2x1
jax: 0.10.0
libtpu: 0.0.40
codegen_flags: <defaults>
</compile_context>

<pallas_src>
import functools
import math

import jax
import jax.numpy as jnp
from jax.experimental import pallas as pl
from jax.experimental.pallas import tpu as pltpu


def _round_up(x, m):
    return ((x + m - 1) // m) * m


def _mark_corner_kernel(img_ref, out_ref, *, h, w, values):
    """out[0, c, i, j] = values[c] if (i < h and j < w) else img[0, c, i, j].

    Block shape is (1, C, TR, W); the mask is 2-D and shared by all channels.
    """
    tr = img_ref.shape[-2]
    width = img_ref.shape[-1]
    row0 = pl.program_id(1) * tr                                  # absolute first row of this tile
    row = row0 + jax.lax.broadcasted_iota(jnp.int32, (tr, width), 0)
    col = jax.lax.broadcasted_iota(jnp.int32, (tr, width), 1)
    mask = (row < h) & (col < w)                                  # (TR, W)
    for c, v in enumerate(values):                                # C is small & static -> unrolled
        chan = img_ref[0, c]                                      # (TR, W)
        fill = jnp.asarray(v, dtype=chan.dtype)
        out_ref[0, c] = jnp.where(mask, fill, chan)


def mark_corner(img, scale=0.02, ratio=1.0, value=(1, 1, 0)):
    """JAX/Pallas equivalent of MarkCorner.forward for NCHW images.

    Note: the Pallas call aliases input 0 to output 0; under jax.jit with the
    image donated this is a true corner-only rewrite, otherwise XLA inserts a
    single protective copy of the input buffer.
    """
    if img.ndim != 4:
        raise ValueError("expected NCHW input")
    N, C, H, W = img.shape

    # value handling (mirrors the PyTorch forward).
    # TODO(synk): value='random' (per-pixel random fill values) is not implemented.
    if isinstance(value, (int, float)):
        value = [value]
    else:
        value = list(value)
    if len(value) not in (1, C):
        raise ValueError(
            "If value is a sequence, it should have either a single value "
            f"or {C} (number of input channels)")
    if len(value) == 1:
        value = value * C

    # get_params: fully static (derived from static shapes).
    area = H * W
    erase_area = area * scale
    h = int(round(math.sqrt(erase_area * ratio)))
    w = int(round(math.sqrt(erase_area / ratio)))
    if not (h < H and w < W):
        # PyTorch returns (0, 0, H, W, img): erase writes img back -> identity.
        return img
    if h <= 0 or w <= 0:
        # Zero-area erase -> identity.
        return img

    # Rows that actually need rewriting, rounded up to the sublane size (8).
    TH = min(H, _round_up(h, 8))

    # Cap rows per grid step so double-buffered in+out blocks stay well inside
    # every generation's scoped-VMEM default (v5e: 16 MiB, v7x: 32 MiB).
    bytes_per_row = C * W * img.dtype.itemsize
    max_block_bytes = 2 * 1024 * 1024
    TR = max(8, min(TH, (max_block_bytes // max(bytes_per_row, 1)) // 8 * 8))
    if TR > H:
        TR = H
    num_row_tiles = pl.cdiv(TH, TR)
    if TR < H and num_row_tiles * TR > H:
        # Only allow a partial block at the true array edge (standard Pallas
        # clipping); if tiles would overrun mid-array, just cover full height.
        num_row_tiles = pl.cdiv(H, TR)

    kernel = functools.partial(
        _mark_corner_kernel, h=h, w=w,
        values=tuple(float(v) for v in value))

    return pl.pallas_call(
        kernel,
        out_shape=jax.ShapeDtypeStruct(img.shape, img.dtype),
        grid=(N, num_row_tiles),
        in_specs=[pl.BlockSpec((1, C, TR, W), lambda n, r: (n, 0, r, 0))],
        out_specs=pl.BlockSpec((1, C, TR, W), lambda n, r: (n, 0, r, 0)),
        # Output buffer == input buffer: rows outside the corner slab are never
        # DMA'd and keep the original pixels.
        input_output_aliases={0: 0},
        compiler_params=pltpu.CompilerParams(
            dimension_semantics=("parallel", "parallel")),
    )(img)


if __name__ == "__main__":
    key = jax.random.PRNGKey(0)
    # value=(1, 1, 0) implies 3 channels, like an RGB image.
    x = jax.random.normal(key, (2, 3, 16, 16), dtype=jnp.float32)

    out = mark_corner(x, scale=0.02, ratio=1.0, value=(1, 1, 0))
    out = jax.block_until_ready(out)

    # Pure-JAX reference check of the same semantics.
    H, W = x.shape[-2], x.shape[-1]
    h = int(round(math.sqrt(H * W * 0.02 * 1.0)))
    w = int(round(math.sqrt(H * W * 0.02 / 1.0)))
    ref = x
    if h < H and w < W:
        v = jnp.asarray([1.0, 1.0, 0.0], dtype=x.dtype).reshape(1, 3, 1, 1)
        ref = ref.at[:, :, 0:h, 0:w].set(jnp.broadcast_to(v, (x.shape[0], 3, h, w)))
    assert out.shape == x.shape and out.dtype == x.dtype
    assert jnp.allclose(out, ref), "mismatch vs reference"

    print("KERNEL_OK")
</pallas_src>

<mosaic_0001>
module attributes {stable_mosaic.version = 11 : i64} {
  func.func @_mark_corner_kernel(%arg0: i32, %arg1: i32, %arg2: memref<1x3x8x16xf32, #tpu.memory_space<vmem>>, %arg3: memref<1x3x8x16xf32, #tpu.memory_space<vmem>>) attributes {dimension_semantics = [#tpu.dimension_semantics<parallel>, #tpu.dimension_semantics<parallel>], iteration_bounds = array<i64: 2, 1>, scalar_prefetch = 0 : i64, scratch_operands = 0 : i64, tpu.core_type = #tpu.core_type<tc>, window_params = [{transform_indices = @transform_0, window_bounds = array<i64: 1, 3, 8, 16>}, {transform_indices = @transform_1, window_bounds = array<i64: 1, 3, 8, 16>}]} {
    %c8_i32 = arith.constant 8 : i32
    %0 = arith.muli %arg1, %c8_i32 : i32
    %1 = tpu.iota {dimensions = array<i32: 0>} : vector<8x16xi32>
    %2 = vector.broadcast %0 : i32 to vector<8x16xi32>
    %3 = arith.addi %2, %1 : vector<8x16xi32>
    %4 = tpu.iota {dimensions = array<i32: 1>} : vector<8x16xi32>
    %c2_i32 = arith.constant 2 : i32
    %5 = vector.broadcast %c2_i32 : i32 to vector<8x16xi32>
    %6 = arith.cmpi slt, %3, %5 : vector<8x16xi32>
    %c2_i32_0 = arith.constant 2 : i32
    %7 = vector.broadcast %c2_i32_0 : i32 to vector<8x16xi32>
    %8 = arith.cmpi slt, %4, %7 : vector<8x16xi32>
    %9 = arith.andi %6, %8 : vector<8x16xi1>
    %c0 = arith.constant 0 : index
    %c0_1 = arith.constant 0 : index
    %c0_2 = arith.constant 0 : index
    %c0_3 = arith.constant 0 : index
    %10 = vector.load %arg2[%c0, %c0_1, %c0_2, %c0_3] : memref<1x3x8x16xf32, #tpu.memory_space<vmem>>, vector<1x1x8x16xf32>
    %11 = vector.shape_cast %10 : vector<1x1x8x16xf32> to vector<8x16xf32>
    %cst = arith.constant 1.000000e+00 : f32
    %12 = vector.broadcast %cst : f32 to vector<8x16xf32>
    %13 = arith.select %9, %12, %11 : vector<8x16xi1>, vector<8x16xf32>
    %c0_4 = arith.constant 0 : index
    %c0_5 = arith.constant 0 : index
    %c0_6 = arith.constant 0 : index
    %c0_7 = arith.constant 0 : index
    %14 = vector.load %arg3[%c0_4, %c0_5, %c0_6, %c0_7] : memref<1x3x8x16xf32, #tpu.memory_space<vmem>>, vector<1x1x8x16xf32>
    %15 = vector.shape_cast %14 : vector<1x1x8x16xf32> to vector<8x16xf32>
    %16 = vector.shape_cast %13 : vector<8x16xf32> to vector<1x1x8x16xf32>
    tpu.vector_store %arg3[%c0_4, %c0_5, %c0_6, %c0_7], %16 {strides = array<i32>} : memref<1x3x8x16xf32, #tpu.memory_space<vmem>>, vector<1x1x8x16xf32>,
    %c0_8 = arith.constant 0 : index
    %c1 = arith.constant 1 : index
    %c0_9 = arith.constant 0 : index
    %c0_10 = arith.constant 0 : index
    %17 = vector.load %arg2[%c0_8, %c1, %c0_9, %c0_10] : memref<1x3x8x16xf32, #tpu.memory_space<vmem>>, vector<1x1x8x16xf32>
    %18 = vector.shape_cast %17 : vector<1x1x8x16xf32> to vector<8x16xf32>
    %cst_11 = arith.constant 1.000000e+00 : f32
    %19 = vector.broadcast %cst_11 : f32 to vector<8x16xf32>
    %20 = arith.select %9, %19, %18 : vector<8x16xi1>, vector<8x16xf32>
    %c0_12 = arith.constant 0 : index
    %c1_13 = arith.constant 1 : index
    %c0_14 = arith.constant 0 : index
    %c0_15 = arith.constant 0 : index
    %21 = vector.load %arg3[%c0_12, %c1_13, %c0_14, %c0_15] : memref<1x3x8x16xf32, #tpu.memory_space<vmem>>, vector<1x1x8x16xf32>
    %22 = vector.shape_cast %21 : vector<1x1x8x16xf32> to vector<8x16xf32>
    %23 = vector.shape_cast %20 : vector<8x16xf32> to vector<1x1x8x16xf32>
    tpu.vector_store %arg3[%c0_12, %c1_13, %c0_14, %c0_15], %23 {strides = array<i32>} : memref<1x3x8x16xf32, #tpu.memory_space<vmem>>, vector<1x1x8x16xf32>,
    %c0_16 = arith.constant 0 : index
    %c2 = arith.constant 2 : index
    %c0_17 = arith.constant 0 : index
    %c0_18 = arith.constant 0 : index
    %24 = vector.load %arg2[%c0_16, %c2, %c0_17, %c0_18] : memref<1x3x8x16xf32, #tpu.memory_space<vmem>>, vector<1x1x8x16xf32>
    %25 = vector.shape_cast %24 : vector<1x1x8x16xf32> to vector<8x16xf32>
    %cst_19 = arith.constant 0.000000e+00 : f32
    %26 = vector.broadcast %cst_19 : f32 to vector<8x16xf32>
    %27 = arith.select %9, %26, %25 : vector<8x16xi1>, vector<8x16xf32>
    %c0_20 = arith.constant 0 : index
    %c2_21 = arith.constant 2 : index
    %c0_22 = arith.constant 0 : index
    %c0_23 = arith.constant 0 : index
    %28 = vector.load %arg3[%c0_20, %c2_21, %c0_22, %c0_23] : memref<1x3x8x16xf32, #tpu.memory_space<vmem>>, vector<1x1x8x16xf32>
    %29 = vector.shape_cast %28 : vector<1x1x8x16xf32> to vector<8x16xf32>
    %30 = vector.shape_cast %27 : vector<8x16xf32> to vector<1x1x8x16xf32>
    tpu.vector_store %arg3[%c0_20, %c2_21, %c0_22, %c0_23], %30 {strides = array<i32>} : memref<1x3x8x16xf32, #tpu.memory_space<vmem>>, vector<1x1x8x16xf32>,
    return
  }
  func.func @transform_0(%arg0: i32, %arg1: i32) -> (i32, i32, i32, i32) {
    %c0_i32 = arith.constant 0 : i32
    %c0_i32_0 = arith.constant 0 : i32
    %c0_i32_1 = arith.constant 0 : i32
    return %arg0, %c0_i32, %arg1, %c0_i32_0 : i32, i32, i32, i32
  }
  func.func @transform_1(%arg0: i32, %arg1: i32) -> (i32, i32, i32, i32) {
    %c0_i32 = arith.constant 0 : i32
    %c0_i32_0 = arith.constant 0 : i32
    %c0_i32_1 = arith.constant 0 : i32
    return %arg0, %c0_i32, %arg1, %c0_i32_0 : i32, i32, i32, i32
  }
}

</mosaic_0001>

<bundles_post_ra>
// kernel: tpu_custom_call.1
= control target key start
LH: loop header
LB: loop body
LE: loop exit
PB: predicated region body
PF: predicated region fallthrough
CT: control target
= control target key end

     0   :  { %6 = vsyncpa [#allocation3], 0  ;;  %s666_s0 = inlined_call_operand.hbm [shape: f32[2,3,16,16], index: 0, kind: input, shape index: {}, may-alias: {0,1}]   ;;  %s667_s1 = inlined_call_operand.hbm [shape: f32[2,3,16,16], index: 1, kind: output, shape index: {}, may-alias: {0,1}]  }
   0x1   :  { %8 = vsyncpa [#allocation3 + $0x1], 0 }
   0x2   :  { %9 = vsyncpa [#allocation4], 0 }
   0x3   :  { %11 = vsyncpa [#allocation4 + $0x1], 0  ;;  %s493_s6 = smov 0   ;;  %s495_s7 = smov 0  }
   0x4   :  { %s497_s8 = smov 0   ;;  %s499_s9 = smov 0  }
   0x5   :  { %s501_s10 = smov 0   ;;  %s503_s11 = smov 0  }
   0x6 LB: > { %s276_s12 = sadd.s32 4294967295, %s473_s11   ;;  %s277_s13 = sadd.s32 4294967294, %s473_s11   ;;  %s473_s11 = sphi %s503_s11, %s17_s11   ;;  %s469_s10 = sphi %s501_s10, %s681_s10   ;;  %s465_s9 = sphi %s499_s9, %s680_s9   ;;  %s461_s8 = sphi %s497_s8, %s679_s8   ;;  %s457_s7 = sphi %s495_s7, %s678_s7   ;;  %s453_s6 = sphi %s493_s6, %s677_s6  }
   0x7   : > { %s29_s14 = sadd.s32 1, %s469_s10  ;;  %s38_s15 = sadd.s32 1, %s461_s8 }
   0x8   : > { %p31_p0 = scmp.ge.s32.totalorder %s29_s14, 2  ;;  %p45_p1 = scmp.ne.s32.totalorder %s461_s8, %s457_s7 }
   0x9   : > { %p46_p2 = scmp.eq.s32.totalorder %s473_s11, 0  ;;  %p51_p3 = scmp.ne.s32.totalorder %s457_s7, %s453_s6 }
   0xa   : > { %s683_s14 = smov (%p31_p0, %s29_s14), 0  ;;  %p52_p5 = scmp.eq.s32.totalorder %s276_s12, 0 }
   0xb   : > { %p534_p4 = por %p46_p2, %p45_p1  ;;  %s33_s17 = ssub.s32 %s469_s10, %s683_s14 }
   0xc   : > { %p77_p6 = scmp.eq.s32.totalorder %s276_s12, 1  ;;  %p36_p7 = scmp.eq.s32.totalorder %s33_s17, 0 }
   0xd   : > { %p540_p8 = por %p52_p5, %p51_p3  ;;  %p83_p10 = scmp.eq.s32.totalorder %s277_s13, 1 }
   0xe   : > { %p544_p9 = por %p77_p6, %p45_p1  ;;  %p305_p13 = scmp.lt.s32.totalorder %s473_s11, 2 }
   0xf   : > { %s549_s20 = scalar_select %p36_p7, %s461_s8, %s38_s15  }
  0x10   : > { %s671_s19 = scalar_select %p544_p9, 1, 0 }
  0x11   : > { %p551_p11 = por %p83_p10, %p51_p3  ;;  %s103_s22 = sand.u32 1, %s461_s8  }
  0x12   : > { %s289_s23 = smul.u32 24, %s103_s22  ;;  %p561_p0 = pnand %p305_p13, %p534_p4 }
  0x13   : > { %s672_s21 = scalar_select %p551_p11, 1, 0 }
  0x14   : > { %s290_s24 = smul.u32 768, %s469_s10  ;;  %s107_s29 = scalar_lea.vmem [#allocation2], %s289_s23 }
  0x15   : > { %s115_s30 = sshll.u32 %s107_s29, 4  ;;  %s572_s2 = scalar_lea.sflag [#allocation3], %s103_s22  ;;  %s570_s30 = int_to_ptr.vmem [resolvable:$true] %s115_s30 }
  0x16   : > { %s568_s28 = scalar_lea.hbm %s666_s0, %s290_s24  ;;  %p363_p2 = pneg %p561_p0 }
  0x17   : > { %s361_s3 = scalar_lea.hbm %s568_s28, 384  ;;  %s366_s12 = scalar_lea.hbm %s666_s0, 1536 }
  0x18   : > { %p362_p1 = scmp.ne.s32.totalorder %s568_s28, %s361_s3  ;;  %p367_p5 = scmp.lt.u32.totalorder %s568_s28, %s666_s0 }
  0x19   : > { %p368_p6 = scmp.lt.u32.totalorder %s366_s12, %s361_s3  ;;  %p370_p10 = scmp.lt.u32.totalorder %s361_s3, %s568_s28 }
  0x1a   : > { %p364_p3 = pnand %p363_p2, %p362_p1 }
  0x1b   : > { %p369_p7 = por %p368_p6, %p367_p5 }
  0x1c   : > { %p365_p4 = pneg %p364_p3 }
  0x1d   : > { %p371_p13 = por %p370_p10, %p369_p7 }
  0x1f   : > { %p372_p12 = pnand %p371_p13, %p365_p4 }
  0x21   : > { %375 = shalt.err (!%p372_p12)
}
  0x22   : > { %s376_s16 = scalar_lea.vmem %s570_s30, 384  ;;  %s475_s17 = smov [#allocation2]  }
  0x23   : > { %p377_p1 = scmp.ne.s32.totalorder %s570_s30, %s376_s16  ;;  %s381_s22 = sshll.u32 %s475_s17, 4  ;;  %s382_s22 = int_to_ptr.vmem [resolvable:$false] %s381_s22 }
  0x24   : > { %s383_s23 = scalar_lea.vmem %s382_s22, 768  ;;  %p384_p9 = scmp.lt.s32.totalorder %s570_s30, %s382_s22 }
  0x25   : > { %p379_p3 = pnand %p377_p1, %p363_p2  ;;  %p385_p5 = scmp.lt.s32.totalorder %s383_s23, %s376_s16 }
  0x27   : > { %p380_p11 = pneg %p379_p3  ;;  %p386_p6 = por %p385_p5, %p384_p9 }
  0x29   : > { %p387_p7 = pnand %p386_p6, %p380_p11 }
  0x2b   : > { %390 = shalt.err (!%p387_p7)
}
  0x2c   : > { %s476_s24 = smov 256   ;;  %s477_s26 = smov 128  }
  0x2d   : > { %s478_s27 = smov 8   ;;  %p281_p12 = scmp.ge.s32.totalorder %s473_s11, 1 }
  0x2e   : > { %300 = dma.hbm_to_vmem [thread:$0]  (!%p561_p0), %s568_s28, 384, %s570_s30, %s572_s2, %s476_s24, %s477_s26, %s478_s27  }
  0x2f   : > { %p123_p2 = scmp.lt.s32.totalorder %s473_s11, 3 }
  0x31   : > { %p124_p4 = pnand %p281_p12, %p123_p2 }
  0x32   : > { %s603_s29 = sand.u32 (!%p124_p4), 1, %s457_s7  }
  0x33   : > { %127 = sbr.rel (%p124_p4) target bundleno = 87 (0x57), region = 24  ;;  %s130_s4 = scalar_lea.sflag (!%p124_p4), [#allocation3], %s603_s29 }
  0x34   : > { %s291_s3 = smul.u32 (!%p124_p4), 24, %s603_s29 }
  0x36   : > { %s133_s5 = scalar_lea.vmem (!%p124_p4), [#allocation2], %s291_s3 }
  0x3a   : > { %444 = dma.done.wait (%p540_p8), %s130_s4, 384  }
  0x3b   : > { %446 = vsyncadd (%p540_p8), %s130_s4, 4294966912  ;;  %v153_v0 = vlaneseq  ;;  %s151_s25 = scalar_lea.vmem [#allocation5], %s291_s3  ;;  %s292_s30 = smul.u32 768, %s465_s9  ;;  %vm164_vm3 = vcmask 130048   ;;  %v162_v3 = vld [vmem:[%s133_s5] sm:$0xff]  ;;  %v282_v4 = vld [vmem:[%s133_s5 + $0x8] sm:$0xff] }
  0x3c   : > { %s191_s28 = sshll.u32 %s151_s25, 4  ;;  %v284_v5 = vld [vmem:[%s133_s5 + $0x10] sm:$0xff]  ;;  %s177_s9 = scalar_lea.sflag [#allocation4], %s603_s29  ;;  %s612_s28 = int_to_ptr.vmem [resolvable:$true] %s191_s28 }
  0x3d   : > { %v154_v1 = vshrl.u32 %v153_v0, 7  ;;  %v158_v2 = vand.u32 127, %v153_v0  ;;  %s617_s12 = scalar_lea.hbm %s667_s1, %s292_s30  ;;  %s391_s13 = scalar_lea.vmem %s612_s28, 384 }
  0x3e   : > { %p392_p8 = scmp.ne.s32.totalorder %s612_s28, %s391_s13  ;;  %p674_p9 = scmp.ne.s32.totalorder %s671_s19, 0 }
  0x3f   : > { %vm159_vm0 = vcmp.lt.s32.totalorder %v154_v1, 2  ;;  %vm160_vm1 = vcmp.lt.s32.totalorder %v158_v2, 2  ;;  %s479_s15 = smov [#allocation5]  }
  0x40   : > { %vm161_vm2 = vmand %vm159_vm0, %vm160_vm1  ;;  %p393_p11 = pnand %p392_p8, %p674_p9  ;;  %s395_s16 = sshll.u32 %s479_s15, 4  ;;  %s396_s16 = int_to_ptr.vmem [resolvable:$false] %s395_s16 }
  0x41   : > { %v163_v6 = vsel %vm161_vm2, 1.0, %v162_v3  ;;  %v168_v7 = vsel %vm161_vm2, 1.0, %v282_v4  ;;  %v173_v8 = vsel %vm161_vm2, 0.0, %v284_v5  ;;  %s397_s17 = scalar_lea.vmem %s396_s16, 768  ;;  %p398_p10 = scmp.lt.s32.totalorder %s612_s28, %s396_s16 }
  0x42   : > { %165 = vst.msk [vmem:[%s151_s25] sm:$0xff] %vm164_vm3, %v163_v6  ;;  %283 = vst.msk [vmem:[%s151_s25 + $0x8] sm:$0xff] %vm164_vm3, %v168_v7  ;;  %p394_p0 = pneg %p393_p11  ;;  %p399_p13 = scmp.lt.s32.totalorder %s397_s17, %s391_s13 }
  0x43   : > { %285 = vst.msk [vmem:[%s151_s25 + $0x10] sm:$0xff] %vm164_vm3, %v173_v8 }
  0x44   : > { %p400_p1 = por %p399_p13, %p398_p10 }
  0x46   : > { %p401_p3 = pnand %p400_p1, %p394_p0 }
  0x48   : > { %404 = shalt.err (!%p401_p3)
}
  0x49   : > { %s405_s22 = scalar_lea.hbm %s617_s12, 384  ;;  %s409_s26 = scalar_lea.hbm %s667_s1, 1536 }
  0x4a   : > { %p406_p5 = scmp.ne.s32.totalorder %s617_s12, %s405_s22  ;;  %p410_p12 = scmp.lt.u32.totalorder %s617_s12, %s667_s1 }
  0x4b   : > { %p411_p2 = scmp.lt.u32.totalorder %s409_s26, %s405_s22  ;;  %p413_p8 = scmp.lt.u32.totalorder %s405_s22, %s617_s12 }
  0x4c   : > { %p407_p6 = pnand %p406_p5, %p674_p9 }
  0x4d   : > { %p412_p4 = por %p411_p2, %p410_p12 }
  0x4e   : > { %p408_p7 = pneg %p407_p6 }
  0x4f   : > { %p414_p11 = por %p413_p8, %p412_p4 }
  0x51   : > { %p415_p0 = pnand %p414_p11, %p408_p7 }
  0x53   : > { %418 = shalt.err (!%p415_p0)
}
  0x54   : > { %s480_s4 = smov 128   ;;  %s481_s5 = smov 256  }
  0x55   : > { %s482_s25 = smov 8  }
  0x56   : > { %295 = dma.vmem_to_hbm [thread:$0]  (%p674_p9), %s612_s28, 384, %s617_s12, %s177_s9, %s480_s4, %s481_s5, %s482_s25  }
  0x57 PF: > { %s206_s30 = sand.u32 1, %s453_s6   ;;  %p675_p10 = scmp.ne.s32.totalorder %s672_s21, 0 }
  0x58   : > { %p676_p13 = scmp.ge.s32.totalorder %s473_s11, 2  ;;  %s207_s2 = scalar_lea.sflag [#allocation4], %s206_s30 }
  0x5a   : > { %p302_p1 = pnand %p676_p13, %p675_p10 }
  0x5c   : > { %448 = dma.done.wait (!%p302_p1), %s207_s2, 384  }
  0x5d   : > { %450 = vsyncadd (!%p302_p1), %s207_s2, 4294966912  ;;  %s17_s11 = sadd.s32 1, %s473_s11   ;;  %s677_s6 = smov %s457_s7 }
  0x5e   : > { %p14_p3 = scmp.ge.s32.totalorder %s17_s11, 4   ;;  %s678_s7 = smov %s461_s8 }
  0x5f   : > { %s679_s8 = smov %s549_s20  ;;  %s680_s9 = smov %s469_s10 }
  0x60   : > { %s681_s10 = smov %s683_s14  ;;  %16 = sbr.rel (!%p14_p3) target bundleno = 6 (0x6), region = 73 }
  0x67   :  { %212 = vsyncpa [#allocation3], 1 }
  0x68   :  { %214 = vsyncpa [#allocation3 + $0x1], 1 }
  0x69   :  { %215 = vsyncpa [#allocation4], 1 }
  0x6a   :  { %217 = vsyncpa [#allocation4 + $0x1], 1 }

</bundles_post_ra>
